<compile_context>
chip_gen: v5e
topology: v5e:2x2
jax: 0.10.0
libtpu: 0.0.40
codegen_flags: <defaults>
</compile_context>

<pallas_src>
import jax
import jax.numpy as jnp
from jax.experimental import pallas as pl
from jax.experimental.pallas import tpu as pltpu  # noqa: F401  (TPU backend)


def linear_kernel(x_ref, p_ref, o_ref):
    # x_ref : (B, Din)          activations
    # p_ref : (Din+1, Dout)     rows 0..Din-1 = W^T, row Din = bias
    # o_ref : (B, Dout)
    x = x_ref[...]
    p = p_ref[...]
    din = x.shape[1]

    # Start the accumulator from the bias row (broadcasts over B),
    # then add Din VPU broadcast-FMAs.  Din is tiny and static, so the
    # Python loop fully unrolls at trace time — no MXU involved.
    acc = p[din:din + 1, :]                      # (1, Dout)
    for k in range(din):
        acc = acc + x[:, k:k + 1] * p[k:k + 1, :]   # (B,1)*(1,Dout) -> (B,Dout)

    o_ref[...] = acc.astype(o_ref.dtype)


def pallas_linear(x, w, b):
    """x:(B,Din)  w:(Dout,Din)  b:(Dout,) -> (B,Dout) via a Pallas kernel."""
    B, Din = x.shape
    Dout = w.shape[0]
    # Hoist the transpose out of the kernel and pack the bias with the weight
    # so the kernel consumes a single parameter stream.
    params = jnp.concatenate([w.T, b.reshape(1, Dout)], axis=0)  # (Din+1, Dout)

    return pl.pallas_call(
        linear_kernel,
        out_shape=jax.ShapeDtypeStruct((B, Dout), x.dtype),
        in_specs=[
            pl.BlockSpec((B, Din), lambda: (0, 0)),
            pl.BlockSpec((Din + 1, Dout), lambda: (0, 0)),
        ],
        out_specs=pl.BlockSpec((B, Dout), lambda: (0, 0)),
    )(x, params)


def model_forward(x, w, b):
    # Sequential(layers, layers): first application is well-defined; the
    # second is shape-incompatible in the reference module (see TODO above).
    y = pallas_linear(x, w, b)
    return y


if __name__ == "__main__":
    key = jax.random.PRNGKey(0)
    kx, kw, kb = jax.random.split(key, 3)

    # Deterministic parameters matching nn.Linear(2, 3) shapes.
    B, Din, Dout = 2, 2, 3
    x = jax.random.normal(kx, (B, Din), dtype=jnp.float32)
    w = jax.random.normal(kw, (Dout, Din), dtype=jnp.float32) * 0.5
    b = jax.random.normal(kb, (Dout,), dtype=jnp.float32) * 0.1

    out = model_forward(x, w, b)
    out = jax.block_until_ready(out)

    # Cross-check against plain-JAX reference.
    ref = x @ w.T + b
    assert out.shape == (B, Dout)
    assert jnp.allclose(out, ref, atol=1e-5, rtol=1e-5)

    print("KERNEL_OK")
</pallas_src>

<mosaic_0001>
module attributes {stable_mosaic.version = 11 : i64} {
  func.func @linear_kernel(%arg0: memref<2x2xf32, #tpu.memory_space<vmem>>, %arg1: memref<3x3xf32, #tpu.memory_space<vmem>>, %arg2: memref<2x3xf32, #tpu.memory_space<vmem>>) attributes {dimension_semantics = [], scalar_prefetch = 0 : i64, scratch_operands = 0 : i64, tpu.core_type = #tpu.core_type<tc>} {
    %c0 = arith.constant 0 : index
    %c0_0 = arith.constant 0 : index
    %0 = vector.load %arg0[%c0, %c0_0] : memref<2x2xf32, #tpu.memory_space<vmem>>, vector<2x2xf32>
    %c0_1 = arith.constant 0 : index
    %c0_2 = arith.constant 0 : index
    %1 = vector.load %arg1[%c0_1, %c0_2] : memref<3x3xf32, #tpu.memory_space<vmem>>, vector<3x3xf32>
    %2 = vector.extract_strided_slice %1 {offsets = [2, 0], sizes = [1, 3], strides = [1, 1]} : vector<3x3xf32> to vector<1x3xf32>
    %3 = vector.extract_strided_slice %0 {offsets = [0, 0], sizes = [2, 1], strides = [1, 1]} : vector<2x2xf32> to vector<2x1xf32>
    %4 = vector.extract_strided_slice %1 {offsets = [0, 0], sizes = [1, 3], strides = [1, 1]} : vector<3x3xf32> to vector<1x3xf32>
    %5 = vector.broadcast %3 : vector<2x1xf32> to vector<2x3xf32>
    %6 = vector.broadcast %4 : vector<1x3xf32> to vector<2x3xf32>
    %7 = arith.mulf %5, %6 : vector<2x3xf32>
    %8 = vector.broadcast %2 : vector<1x3xf32> to vector<2x3xf32>
    %9 = arith.addf %8, %7 : vector<2x3xf32>
    %10 = vector.extract_strided_slice %0 {offsets = [0, 1], sizes = [2, 1], strides = [1, 1]} : vector<2x2xf32> to vector<2x1xf32>
    %11 = vector.extract_strided_slice %1 {offsets = [1, 0], sizes = [1, 3], strides = [1, 1]} : vector<3x3xf32> to vector<1x3xf32>
    %12 = vector.broadcast %10 : vector<2x1xf32> to vector<2x3xf32>
    %13 = vector.broadcast %11 : vector<1x3xf32> to vector<2x3xf32>
    %14 = arith.mulf %12, %13 : vector<2x3xf32>
    %15 = arith.addf %9, %14 : vector<2x3xf32>
    %c0_3 = arith.constant 0 : index
    %c0_4 = arith.constant 0 : index
    %16 = vector.load %arg2[%c0_3, %c0_4] : memref<2x3xf32, #tpu.memory_space<vmem>>, vector<2x3xf32>
    tpu.vector_store %arg2[%c0_3, %c0_4], %15 {strides = array<i32>} : memref<2x3xf32, #tpu.memory_space<vmem>>, vector<2x3xf32>,
    return
  }
}

</mosaic_0001>

<bundles_post_ra>
// kernel: tpu_custom_call.1
= control target key start
LH: loop header
LB: loop body
LE: loop exit
PB: predicated region body
PF: predicated region fallthrough
CT: control target
= control target key end

     0   :  { %7 = vsyncpa [#allocation3], 0  ;;  %s192_s0 = inlined_call_operand.hbm [shape: f32[2,2], index: 0, kind: input, shape index: {}]   ;;  %s193_s1 = inlined_call_operand.hbm [shape: f32[3,3], index: 1, kind: input, shape index: {}]   ;;  %s194_s2 = inlined_call_operand.hbm [shape: f32[2,3], index: 2, kind: output, shape index: {}]  }
   0x1   :  { %8 = vsyncpa [#allocation6], 0 }
   0x2   :  { %9 = vsyncpa [#allocation4], 0  ;;  %s15_s11 = sshll.u32 %s192_s0, 4  ;;  %s163_s12 = smov [#allocation2]   ;;  %s16_s11 = int_to_ptr.hbm [resolvable:$true] %s15_s11 }
   0x3   :  { %s17_s13 = sshll.u32 %s163_s12, 4  ;;  %s26_s16 = sshll.u32 %s193_s1, 4  ;;  %s18_s13 = int_to_ptr.vmem [resolvable:$true] %s17_s13  ;;  %s27_s16 = int_to_ptr.hbm [resolvable:$true] %s26_s16 }
   0x4   :  { %20 = dma.hbm_to_vmem [thread:$0]  %s16_s11, 32, %s18_s13, [#allocation3]  }
   0x5   :  { %s164_s17 = smov [#allocation5]  }
   0x6   :  { %s28_s18 = sshll.u32 %s164_s17, 4  ;;  %s29_s18 = int_to_ptr.vmem [resolvable:$true] %s28_s18 }
   0x7   :  { %31 = dma.hbm_to_vmem [thread:$0]  %s27_s16, 64, %s29_s18, [#allocation6]  }
   0x8   :  { %157 = dma.done.wait [#allocation3], 32  }
   0x9   :  { %158 = vsyncadd [#allocation3], 4294967264 }
   0xa   :  { %159 = dma.done.wait [#allocation6], 64  }
   0xb   :  { %160 = vsyncadd [#allocation6], 4294967232  ;;  %v165_v0 = vmov 0   ;;  %v40_v1 = vld [vmem:[#allocation2] sm:$0x3]  ;;  %v166_v2 = vmov 1  }
   0xc   :  { %83 = vset.pattern.permute.xlu0 %v165_v0  ;;  %v41_v3 = vld [vmem:[#allocation5] sm:$0x7]  ;;  %s167_s0 = smov [#allocation7]   ;;  %s67_s21 = sshll.u32 %s194_s2, 4  ;;  %vm58_vm0 = vcmask 17408   ;;  %s68_s21 = int_to_ptr.hbm [resolvable:$true] %s67_s21 }
   0xd   :  { %44 = vperm.xlu0 %83, %v40_v1   ;;  %v47_v5 = vperm.slane %v41_v3, 0  ;;  %v49_v6 = vperm.slane %v41_v3, 2  ;;  %v55_v8 = vperm.slane %v41_v3, 1  ;;  %s65_s1 = sshll.u32 %s167_s0, 4  ;;  %s66_s1 = int_to_ptr.vmem [resolvable:$true] %s65_s1 }
  0x15   :  { %84 = vset.pattern.permute.xlu0 %v166_v2 }
  0x16   :  { %52 = vperm.xlu0 %84, %v40_v1  }
  0x7f   :  { %v45_v4 = vpop.permute.xlu0 %44 }
  0x80   :  { %v48_v7 = vmul.f32 %v47_v5, %v45_v4 }
  0x82   :  { %v50_v10 = vadd.f32 %v49_v6, %v48_v7 }
  0x88   :  { %v53_v9 = vpop.permute.xlu0 %52 }
  0x89   :  { %v56_v11 = vmul.f32 %v55_v8, %v53_v9 }
  0x8b   :  { %v57_v12 = vadd.f32 %v56_v11, %v50_v10 }
  0x8d   :  { %59 = vst.msk [vmem:[#allocation7] sm:$0x3] %vm58_vm0, %v57_v12 }
  0x8e   :  { %70 = dma.vmem_to_hbm [thread:$0]  %s66_s1, 32, %s68_s21, [#allocation4]  }
  0x8f   :  { %161 = dma.done.wait [#allocation4], 32  }
  0x90   :  { %162 = vsyncadd [#allocation4], 4294967264 }
  0x91   :  { %75 = vsyncpa [#allocation3], 1 }
  0x92   :  { %76 = vsyncpa [#allocation6], 1 }
  0x93   :  { %77 = vsyncpa [#allocation4], 1 }

</bundles_post_ra>
